<compile_context>
chip_gen: v7x
topology: tpu7x:2x2x1
jax: 0.10.0
libtpu: 0.0.40
codegen_flags: <defaults>
</compile_context>

<pallas_src>
import functools

import jax
import jax.numpy as jnp
from jax import lax
from jax.experimental import pallas as pl
from jax.experimental.pallas import tpu as pltpu

LN_EPS = 1e-5
LANE = 128
SUBLANE = 8


def _round_up(n, m):
    return ((n + m - 1) // m) * m


# ----------------------------- kernel body -----------------------------------
def _layernorm_padded(v, gamma, beta, inv_n):
    # `v`, `gamma`, `beta` are exactly zero in padded lanes, so the lane sums
    # equal the sums over the H real features and the padded output lanes stay
    # exactly zero (no mask multiply needed).  inv_n = 1/H (real feature count).
    mu = jnp.sum(v, axis=-1, keepdims=True) * inv_n
    var = jnp.sum(v * v, axis=-1, keepdims=True) * inv_n - mu * mu
    return (v - mu) * lax.rsqrt(var + LN_EPS) * gamma + beta


def lnn_kernel(
    xh0_ref,    # (TB, CAT0)  bf16  lanes [0:D)=x, [D:D+H)=h0_prev
    h0p_ref,    # (TB, HP)    f32   h0_prev (leak term; aliased -> h0 out)
    h1p_ref,    # (TB, HP)    f32   h1_prev (leak term; aliased -> h1 out)
    h1ps_ref,   # (TB, HP)    bf16  h1_prev pre-shifted to lanes [H:2H)
    wcat0_ref,  # (CAT0, HP)  bf16  W_in0 rows [0:D), W_rec0 rows [D:D+H)
    wcat1_ref,  # (HP, HP)    bf16  W_in1 rows [0:H), W_rec1 rows [H:2H)
    fc1w_ref,   # (HP, HP)    bf16
    fc2w_ref,   # (HP, OP)    bf16
    vec_ref,    # (16, VEC_W) f32   packed vector params (row layout: wrapper)
    out_ref,    # (TB, OP)    f32
    h0_ref,     # (TB, HP)    f32
    h1_ref,     # (TB, HP)    f32
    *, h_pad, o_pad, inv_n,
):
    f32, bf16 = jnp.float32, jnp.bfloat16

    # ---------------- layer-0 liquid cell (one fused MXU dot) ----------------
    pre0 = (jnp.dot(xh0_ref[...], wcat0_ref[...], preferred_element_type=f32)
            + vec_ref[0:1, :h_pad])
    pre0 = _layernorm_padded(pre0, vec_ref[1:2, :h_pad], vec_ref[2:3, :h_pad],
                             inv_n)
    h0_prev = h0p_ref[...]
    h0 = h0_prev + (jnp.tanh(pre0) - h0_prev) * vec_ref[3:4, :h_pad]  # * 1/tau

    # -------- layer-1 liquid cell (disjoint-lane add replaces concat) --------
    xh1 = h0.astype(bf16) + h1ps_ref[...]     # lanes [0:H)=h0, [H:2H)=h1_prev
    pre1 = (jnp.dot(xh1, wcat1_ref[...], preferred_element_type=f32)
            + vec_ref[4:5, :h_pad])
    pre1 = _layernorm_padded(pre1, vec_ref[5:6, :h_pad], vec_ref[6:7, :h_pad],
                             inv_n)
    h1_prev = h1p_ref[...]
    h1 = h1_prev + (jnp.tanh(pre1) - h1_prev) * vec_ref[7:8, :h_pad]

    # --- head: LN -> Dropout(id) -> Linear -> ReLU -> Dropout(id) -> Linear --
    o = _layernorm_padded(h1, vec_ref[8:9, :h_pad], vec_ref[9:10, :h_pad],
                          inv_n)
    o = jnp.maximum(
        jnp.dot(o.astype(bf16), fc1w_ref[...], preferred_element_type=f32)
        + vec_ref[10:11, :h_pad], 0.0)
    out = (jnp.dot(o.astype(bf16), fc2w_ref[...], preferred_element_type=f32)
           + vec_ref[11:12, :o_pad])

    out_ref[...] = out.astype(out_ref.dtype)
    h0_ref[...] = h0.astype(h0_ref.dtype)
    h1_ref[...] = h1.astype(h1_ref.dtype)


# ----------------------------- wrapper ----------------------------------------
def make_lnn_forward(params):
    """Packs / pads / bf16-casts the parameters ONCE (hoisted out of the hot
    path) and returns a jitted forward(x, h_prev_list) -> (out, [h0, h1])."""
    f32, bf16 = jnp.float32, jnp.bfloat16

    D_in = params["w_in0"].shape[0]
    H = params["w_rec0"].shape[0]
    O = params["fc2_w"].shape[1]

    H_PAD = _round_up(H, LANE)
    O_PAD = _round_up(O, LANE)
    CAT0 = _round_up(D_in + H, LANE)
    VEC_W = max(H_PAD, O_PAD)

    # TODO(synk): layer-1 lane fusion assumes 2*H <= H_PAD; fall back to an
    # in-kernel concat (2*H_PAD-wide operand) for wider hidden sizes.
    assert 2 * H <= H_PAD, "layer-1 lane fusion requires 2*H <= round_up(H,128)"

    def pad2(a, rows, cols):
        a = jnp.asarray(a, f32)
        return jnp.pad(a, ((0, rows - a.shape[0]), (0, cols - a.shape[1])))

    def padrow(v):
        v = jnp.asarray(v, f32).reshape(1, -1)
        return jnp.pad(v, ((0, 0), (0, VEC_W - v.shape[1])))

    # Fused cell weights:  pre = [x | h_prev] @ [W_in ; W_rec] + (b_in + b_rec)
    w_cat0 = jnp.zeros((CAT0, H_PAD), f32)
    w_cat0 = w_cat0.at[:D_in, :H].set(jnp.asarray(params["w_in0"], f32))
    w_cat0 = w_cat0.at[D_in:D_in + H, :H].set(jnp.asarray(params["w_rec0"], f32))
    w_cat0 = w_cat0.astype(bf16)

    w_cat1 = jnp.zeros((H_PAD, H_PAD), f32)
    w_cat1 = w_cat1.at[:H, :H].set(jnp.asarray(params["w_in1"], f32))
    w_cat1 = w_cat1.at[H:2 * H, :H].set(jnp.asarray(params["w_rec1"], f32))
    w_cat1 = w_cat1.astype(bf16)

    fc1_w = pad2(params["fc1_w"], H_PAD, H_PAD).astype(bf16)
    fc2_w = pad2(params["fc2_w"], H_PAD, O_PAD).astype(bf16)

    # Packed (16, VEC_W) vector params.  Row layout must match the kernel.
    rows = [
        padrow(params["b_in0"] + params["b_rec0"]),  # 0: fused bias, layer 0
        padrow(params["ln0_g"]),                     # 1
        padrow(params["ln0_b"]),                     # 2
        padrow(1.0 / params["tau0"]),                # 3: precomputed 1/tau
        padrow(params["b_in1"] + params["b_rec1"]),  # 4: fused bias, layer 1
        padrow(params["ln1_g"]),                     # 5
        padrow(params["ln1_b"]),                     # 6
        padrow(1.0 / params["tau1"]),                # 7
        padrow(params["ln_norm_g"]),                 # 8
        padrow(params["ln_norm_b"]),                 # 9
        padrow(params["fc1_b"]),                     # 10
        padrow(params["fc2_b"]),                     # 11
    ]
    vecs = jnp.concatenate(rows, axis=0)
    vecs = jnp.pad(vecs, ((0, 16 - vecs.shape[0]), (0, 0)))

    kernel = functools.partial(
        lnn_kernel, h_pad=H_PAD, o_pad=O_PAD, inv_n=1.0 / H)

    def forward(x, h_prev_list):
        B = x.shape[0]
        if B <= 64:
            TB = _round_up(B, SUBLANE)
        else:
            # Split into >=2 "parallel" programs so v7x's 2 TensorCores both
            # engage; 16-row alignment keeps bf16 batch blocks tile-friendly.
            TB = min(_round_up((B + 1) // 2, 16), 128)
        B_PAD = _round_up(B, TB)
        grid = (B_PAD // TB,)

        x32 = jnp.asarray(x, f32)
        h0_prev = jnp.asarray(h_prev_list[0], f32)
        h1_prev = jnp.asarray(h_prev_list[1], f32)

        # layer-0 MXU operand: [x | h0_prev] packed into one 128-lane tile
        xh0 = jnp.concatenate([x32, h0_prev], axis=-1)
        xh0 = jnp.pad(xh0,
                      ((0, B_PAD - B), (0, CAT0 - (D_in + H)))).astype(bf16)
        # lane-aligned f32 carried state (leak terms / aliased state outputs)
        h0p = jnp.pad(h0_prev, ((0, B_PAD - B), (0, H_PAD - H)))
        h1p = jnp.pad(h1_prev, ((0, B_PAD - B), (0, H_PAD - H)))
        # layer-1 MXU operand: h1_prev pre-shifted to lanes [H:2H)
        h1ps = jnp.pad(h1_prev,
                       ((0, B_PAD - B), (H, H_PAD - 2 * H))).astype(bf16)

        out_p, h0_p, h1_p = pl.pallas_call(
            kernel,
            grid=grid,
            in_specs=[
                pl.BlockSpec((TB, CAT0), lambda i: (i, 0)),
                pl.BlockSpec((TB, H_PAD), lambda i: (i, 0)),
                pl.BlockSpec((TB, H_PAD), lambda i: (i, 0)),
                pl.BlockSpec((TB, H_PAD), lambda i: (i, 0)),
                pl.BlockSpec((CAT0, H_PAD), lambda i: (0, 0)),
                pl.BlockSpec((H_PAD, H_PAD), lambda i: (0, 0)),
                pl.BlockSpec((H_PAD, H_PAD), lambda i: (0, 0)),
                pl.BlockSpec((H_PAD, O_PAD), lambda i: (0, 0)),
                pl.BlockSpec((16, VEC_W), lambda i: (0, 0)),
            ],
            out_specs=(
                pl.BlockSpec((TB, O_PAD), lambda i: (i, 0)),
                pl.BlockSpec((TB, H_PAD), lambda i: (i, 0)),
                pl.BlockSpec((TB, H_PAD), lambda i: (i, 0)),
            ),
            out_shape=(
                jax.ShapeDtypeStruct((B_PAD, O_PAD), f32),
                jax.ShapeDtypeStruct((B_PAD, H_PAD), f32),
                jax.ShapeDtypeStruct((B_PAD, H_PAD), f32),
            ),
            # write the new recurrent state in place over the old padded state
            input_output_aliases={1: 1, 2: 2},
            compiler_params=pltpu.CompilerParams(
                dimension_semantics=("parallel",)),
        )(xh0, h0p, h1p, h1ps, w_cat0, w_cat1, fc1_w, fc2_w, vecs)

        return out_p[:B, :O], [h0_p[:B, :H], h1_p[:B, :H]]

    return jax.jit(forward)


# --------------------------- reference (pure JAX, f32) -------------------------
def lnn_reference(x, h_prev_list, p):
    def ln(v, g, b):
        mu = jnp.mean(v, axis=-1, keepdims=True)
        var = jnp.mean((v - mu) ** 2, axis=-1, keepdims=True)
        return (v - mu) / jnp.sqrt(var + LN_EPS) * g + b

    def cell(xx, hp, w_in, b_in, w_rec, b_rec, g, b, tau):
        pre = xx @ w_in + b_in + hp @ w_rec + b_rec
        pre = ln(pre, g, b)
        return hp + (jnp.tanh(pre) - hp) / tau

    h0 = cell(x, h_prev_list[0], p["w_in0"], p["b_in0"], p["w_rec0"],
              p["b_rec0"], p["ln0_g"], p["ln0_b"], p["tau0"])
    h1 = cell(h0, h_prev_list[1], p["w_in1"], p["b_in1"], p["w_rec1"],
              p["b_rec1"], p["ln1_g"], p["ln1_b"], p["tau1"])
    o = ln(h1, p["ln_norm_g"], p["ln_norm_b"])
    o = jnp.maximum(o @ p["fc1_w"] + p["fc1_b"], 0.0)
    out = o @ p["fc2_w"] + p["fc2_b"]
    return out, [h0, h1]


# --------------------------- parameter init ------------------------------------
def init_params(key, input_size, hidden, output_size):
    def linear(k, fan_in, fan_out):
        kw, kb = jax.random.split(k)
        lim = 1.0 / jnp.sqrt(float(fan_in))
        w = jax.random.uniform(kw, (fan_in, fan_out), jnp.float32, -lim, lim)
        b = jax.random.uniform(kb, (1, fan_out), jnp.float32, -lim, lim)
        return w, b

    keys = jax.random.split(key, 8)
    w_in0, b_in0 = linear(keys[0], input_size, hidden)
    w_rec0, b_rec0 = linear(keys[1], hidden, hidden)
    w_in1, b_in1 = linear(keys[2], hidden, hidden)
    w_rec1, b_rec1 = linear(keys[3], hidden, hidden)
    fc1_w, fc1_b = linear(keys[4], hidden, hidden)
    fc2_w, fc2_b = linear(keys[5], hidden, output_size)

    ones_h = jnp.ones((1, hidden), jnp.float32)
    zeros_h = jnp.zeros((1, hidden), jnp.float32)
    # positive time constants (not all 1 so the leak term matters)
    tau0 = 1.0 + 0.5 * jax.random.uniform(keys[6], (1, hidden), jnp.float32)
    tau1 = 1.0 + 0.5 * jax.random.uniform(keys[7], (1, hidden), jnp.float32)

    return dict(
        w_in0=w_in0, b_in0=b_in0, w_rec0=w_rec0, b_rec0=b_rec0,
        ln0_g=ones_h, ln0_b=zeros_h, tau0=tau0,
        w_in1=w_in1, b_in1=b_in1, w_rec1=w_rec1, b_rec1=b_rec1,
        ln1_g=ones_h, ln1_b=zeros_h, tau1=tau1,
        ln_norm_g=ones_h, ln_norm_b=zeros_h,
        fc1_w=fc1_w, fc1_b=fc1_b, fc2_w=fc2_w, fc2_b=fc2_b,
    )


if __name__ == "__main__":
    # small shapes: batch=8, input_size=16, neuron_num=32, output_size=4, depth=2
    B, D_IN, H, O = 8, 16, 32, 4

    key = jax.random.PRNGKey(0)
    k_x, k_h0, k_h1, k_p = jax.random.split(key, 4)
    x = jax.random.normal(k_x, (B, D_IN), jnp.float32)
    # non-zero carried state so the recurrent (W_rec / leak) path is exercised
    h_prev = [0.5 * jax.random.normal(k_h0, (B, H), jnp.float32),
              0.5 * jax.random.normal(k_h1, (B, H), jnp.float32)]
    params = init_params(k_p, D_IN, H, O)

    fwd = make_lnn_forward(params)          # one-time packing + jit
    out, h_list = jax.block_until_ready(fwd(x, h_prev))
    ref_out, ref_h = lnn_reference(x, h_prev, params)

    assert out.shape == (B, O)
    assert h_list[0].shape == (B, H) and h_list[1].shape == (B, H)
    # The kernel feeds the MXU bf16 operands (weights + LHS activations), so
    # expect ~1e-2 absolute deviation from the pure-f32 reference.
    assert jnp.allclose(out, ref_out, atol=5e-2, rtol=5e-2)
    assert jnp.allclose(h_list[0], ref_h[0], atol=5e-2, rtol=5e-2)
    assert jnp.allclose(h_list[1], ref_h[1], atol=5e-2, rtol=5e-2)

    print("KERNEL_OK")
</pallas_src>

<mosaic_0001>
module attributes {stable_mosaic.version = 11 : i64} {
  func.func @lnn_kernel(%arg0: i32, %arg1: memref<8x128xbf16, #tpu.memory_space<vmem>>, %arg2: memref<8x128xf32, #tpu.memory_space<vmem>>, %arg3: memref<8x128xf32, #tpu.memory_space<vmem>>, %arg4: memref<8x128xbf16, #tpu.memory_space<vmem>>, %arg5: memref<128x128xbf16, #tpu.memory_space<vmem>>, %arg6: memref<128x128xbf16, #tpu.memory_space<vmem>>, %arg7: memref<128x128xbf16, #tpu.memory_space<vmem>>, %arg8: memref<128x128xbf16, #tpu.memory_space<vmem>>, %arg9: memref<16x128xf32, #tpu.memory_space<vmem>>, %arg10: memref<8x128xf32, #tpu.memory_space<vmem>>, %arg11: memref<8x128xf32, #tpu.memory_space<vmem>>, %arg12: memref<8x128xf32, #tpu.memory_space<vmem>>) attributes {dimension_semantics = [#tpu.dimension_semantics<parallel>], iteration_bounds = array<i64: 1>, scalar_prefetch = 0 : i64, scratch_operands = 0 : i64, tpu.core_type = #tpu.core_type<tc>, window_params = [{transform_indices = @transform_0, window_bounds = array<i64: 8, 128>}, {transform_indices = @transform_1, window_bounds = array<i64: 8, 128>}, {transform_indices = @transform_2, window_bounds = array<i64: 8, 128>}, {transform_indices = @transform_3, window_bounds = array<i64: 8, 128>}, {pipeline_mode = #tpu.pipeline_mode<synchronous>, transform_indices = @transform_4, window_bounds = array<i64: 128, 128>}, {pipeline_mode = #tpu.pipeline_mode<synchronous>, transform_indices = @transform_5, window_bounds = array<i64: 128, 128>}, {pipeline_mode = #tpu.pipeline_mode<synchronous>, transform_indices = @transform_6, window_bounds = array<i64: 128, 128>}, {pipeline_mode = #tpu.pipeline_mode<synchronous>, transform_indices = @transform_7, window_bounds = array<i64: 128, 128>}, {pipeline_mode = #tpu.pipeline_mode<synchronous>, transform_indices = @transform_8, window_bounds = array<i64: 16, 128>}, {transform_indices = @transform_9, window_bounds = array<i64: 8, 128>}, {transform_indices = @transform_10, window_bounds = array<i64: 8, 128>}, {transform_indices = @transform_11, window_bounds = array<i64: 8, 128>}]} {
    %c0 = arith.constant 0 : index
    %c0_0 = arith.constant 0 : index
    %0 = vector.load %arg1[%c0, %c0_0] : memref<8x128xbf16, #tpu.memory_space<vmem>>, vector<8x128xbf16>
    %c0_1 = arith.constant 0 : index
    %c0_2 = arith.constant 0 : index
    %1 = vector.load %arg5[%c0_1, %c0_2] : memref<128x128xbf16, #tpu.memory_space<vmem>>, vector<128x128xbf16>
    %cst = arith.constant dense<0.000000e+00> : vector<8x128xf32>
    %2 = tpu.matmul %0, %1, %cst {dimension_numbers = #tpu.dot_dimension_numbers<[1], [0], [0], [1], [0, 0, 1, 1], [], []>} : vector<8x128xbf16>, vector<128x128xbf16>, vector<8x128xf32> -> vector<8x128xf32>
    %c0_3 = arith.constant 0 : index
    %c0_4 = arith.constant 0 : index
    %3 = vector.load %arg9[%c0_3, %c0_4] : memref<16x128xf32, #tpu.memory_space<vmem>>, vector<1x128xf32>
    %4 = vector.broadcast %3 : vector<1x128xf32> to vector<8x128xf32>
    %5 = arith.addf %2, %4 : vector<8x128xf32>
    %c1 = arith.constant 1 : index
    %c0_5 = arith.constant 0 : index
    %6 = vector.load %arg9[%c1, %c0_5] : memref<16x128xf32, #tpu.memory_space<vmem>>, vector<1x128xf32>
    %c2 = arith.constant 2 : index
    %c0_6 = arith.constant 0 : index
    %7 = vector.load %arg9[%c2, %c0_6] : memref<16x128xf32, #tpu.memory_space<vmem>>, vector<1x128xf32>
    %cst_7 = arith.constant dense<0.000000e+00> : vector<8xf32>
    %8 = vector.multi_reduction <add>, %5, %cst_7 [1] : vector<8x128xf32> to vector<8xf32>
    %9 = vector.shape_cast %8 : vector<8xf32> to vector<8x1xf32>
    %cst_8 = arith.constant 3.125000e-02 : f32
    %10 = vector.broadcast %cst_8 : f32 to vector<8x1xf32>
    %11 = arith.mulf %9, %10 : vector<8x1xf32>
    %12 = arith.mulf %5, %5 : vector<8x128xf32>
    %cst_9 = arith.constant dense<0.000000e+00> : vector<8xf32>
    %13 = vector.multi_reduction <add>, %12, %cst_9 [1] : vector<8x128xf32> to vector<8xf32>
    %14 = vector.shape_cast %13 : vector<8xf32> to vector<8x1xf32>
    %cst_10 = arith.constant 3.125000e-02 : f32
    %15 = vector.broadcast %cst_10 : f32 to vector<8x1xf32>
    %16 = arith.mulf %14, %15 : vector<8x1xf32>
    %17 = arith.mulf %11, %11 : vector<8x1xf32>
    %18 = arith.subf %16, %17 : vector<8x1xf32>
    %19 = vector.broadcast %11 : vector<8x1xf32> to vector<8x128xf32>
    %20 = arith.subf %5, %19 : vector<8x128xf32>
    %cst_11 = arith.constant 9.99999974E-6 : f32
    %21 = vector.broadcast %cst_11 : f32 to vector<8x1xf32>
    %22 = arith.addf %18, %21 : vector<8x1xf32>
    %23 = math.rsqrt %22 : vector<8x1xf32>
    %24 = vector.broadcast %23 : vector<8x1xf32> to vector<8x128xf32>
    %25 = arith.mulf %20, %24 : vector<8x128xf32>
    %26 = vector.broadcast %6 : vector<1x128xf32> to vector<8x128xf32>
    %27 = arith.mulf %25, %26 : vector<8x128xf32>
    %28 = vector.broadcast %7 : vector<1x128xf32> to vector<8x128xf32>
    %29 = arith.addf %27, %28 : vector<8x128xf32>
    %c0_12 = arith.constant 0 : index
    %c0_13 = arith.constant 0 : index
    %30 = vector.load %arg2[%c0_12, %c0_13] : memref<8x128xf32, #tpu.memory_space<vmem>>, vector<8x128xf32>
    %31 = math.tanh %29 : vector<8x128xf32>
    %32 = arith.subf %31, %30 : vector<8x128xf32>
    %c3 = arith.constant 3 : index
    %c0_14 = arith.constant 0 : index
    %33 = vector.load %arg9[%c3, %c0_14] : memref<16x128xf32, #tpu.memory_space<vmem>>, vector<1x128xf32>
    %34 = vector.broadcast %33 : vector<1x128xf32> to vector<8x128xf32>
    %35 = arith.mulf %32, %34 : vector<8x128xf32>
    %36 = arith.addf %30, %35 : vector<8x128xf32>
    %37 = arith.truncf %36 : vector<8x128xf32> to vector<8x128xbf16>
    %c0_15 = arith.constant 0 : index
    %c0_16 = arith.constant 0 : index
    %38 = vector.load %arg4[%c0_15, %c0_16] : memref<8x128xbf16, #tpu.memory_space<vmem>>, vector<8x128xbf16>
    %39 = arith.addf %37, %38 : vector<8x128xbf16>
    %c0_17 = arith.constant 0 : index
    %c0_18 = arith.constant 0 : index
    %40 = vector.load %arg6[%c0_17, %c0_18] : memref<128x128xbf16, #tpu.memory_space<vmem>>, vector<128x128xbf16>
    %cst_19 = arith.constant dense<0.000000e+00> : vector<8x128xf32>
    %41 = tpu.matmul %39, %40, %cst_19 {dimension_numbers = #tpu.dot_dimension_numbers<[1], [0], [0], [1], [0, 0, 1, 1], [], []>} : vector<8x128xbf16>, vector<128x128xbf16>, vector<8x128xf32> -> vector<8x128xf32>
    %c4 = arith.constant 4 : index
    %c0_20 = arith.constant 0 : index
    %42 = vector.load %arg9[%c4, %c0_20] : memref<16x128xf32, #tpu.memory_space<vmem>>, vector<1x128xf32>
    %43 = vector.broadcast %42 : vector<1x128xf32> to vector<8x128xf32>
    %44 = arith.addf %41, %43 : vector<8x128xf32>
    %c5 = arith.constant 5 : index
    %c0_21 = arith.constant 0 : index
    %45 = vector.load %arg9[%c5, %c0_21] : memref<16x128xf32, #tpu.memory_space<vmem>>, vector<1x128xf32>
    %c6 = arith.constant 6 : index
    %c0_22 = arith.constant 0 : index
    %46 = vector.load %arg9[%c6, %c0_22] : memref<16x128xf32, #tpu.memory_space<vmem>>, vector<1x128xf32>
    %cst_23 = arith.constant dense<0.000000e+00> : vector<8xf32>
    %47 = vector.multi_reduction <add>, %44, %cst_23 [1] : vector<8x128xf32> to vector<8xf32>
    %48 = vector.shape_cast %47 : vector<8xf32> to vector<8x1xf32>
    %cst_24 = arith.constant 3.125000e-02 : f32
    %49 = vector.broadcast %cst_24 : f32 to vector<8x1xf32>
    %50 = arith.mulf %48, %49 : vector<8x1xf32>
    %51 = arith.mulf %44, %44 : vector<8x128xf32>
    %cst_25 = arith.constant dense<0.000000e+00> : vector<8xf32>
    %52 = vector.multi_reduction <add>, %51, %cst_25 [1] : vector<8x128xf32> to vector<8xf32>
    %53 = vector.shape_cast %52 : vector<8xf32> to vector<8x1xf32>
    %cst_26 = arith.constant 3.125000e-02 : f32
    %54 = vector.broadcast %cst_26 : f32 to vector<8x1xf32>
    %55 = arith.mulf %53, %54 : vector<8x1xf32>
    %56 = arith.mulf %50, %50 : vector<8x1xf32>
    %57 = arith.subf %55, %56 : vector<8x1xf32>
    %58 = vector.broadcast %50 : vector<8x1xf32> to vector<8x128xf32>
    %59 = arith.subf %44, %58 : vector<8x128xf32>
    %cst_27 = arith.constant 9.99999974E-6 : f32
    %60 = vector.broadcast %cst_27 : f32 to vector<8x1xf32>
    %61 = arith.addf %57, %60 : vector<8x1xf32>
    %62 = math.rsqrt %61 : vector<8x1xf32>
    %63 = vector.broadcast %62 : vector<8x1xf32> to vector<8x128xf32>
    %64 = arith.mulf %59, %63 : vector<8x128xf32>
    %65 = vector.broadcast %45 : vector<1x128xf32> to vector<8x128xf32>
    %66 = arith.mulf %64, %65 : vector<8x128xf32>
    %67 = vector.broadcast %46 : vector<1x128xf32> to vector<8x128xf32>
    %68 = arith.addf %66, %67 : vector<8x128xf32>
    %c0_28 = arith.constant 0 : index
    %c0_29 = arith.constant 0 : index
    %69 = vector.load %arg3[%c0_28, %c0_29] : memref<8x128xf32, #tpu.memory_space<vmem>>, vector<8x128xf32>
    %70 = math.tanh %68 : vector<8x128xf32>
    %71 = arith.subf %70, %69 : vector<8x128xf32>
    %c7 = arith.constant 7 : index
    %c0_30 = arith.constant 0 : index
    %72 = vector.load %arg9[%c7, %c0_30] : memref<16x128xf32, #tpu.memory_space<vmem>>, vector<1x128xf32>
    %73 = vector.broadcast %72 : vector<1x128xf32> to vector<8x128xf32>
    %74 = arith.mulf %71, %73 : vector<8x128xf32>
    %75 = arith.addf %69, %74 : vector<8x128xf32>
    %c8 = arith.constant 8 : index
    %c0_31 = arith.constant 0 : index
    %76 = vector.load %arg9[%c8, %c0_31] : memref<16x128xf32, #tpu.memory_space<vmem>>, vector<1x128xf32>
    %c9 = arith.constant 9 : index
    %c0_32 = arith.constant 0 : index
    %77 = vector.load %arg9[%c9, %c0_32] : memref<16x128xf32, #tpu.memory_space<vmem>>, vector<1x128xf32>
    %cst_33 = arith.constant dense<0.000000e+00> : vector<8xf32>
    %78 = vector.multi_reduction <add>, %75, %cst_33 [1] : vector<8x128xf32> to vector<8xf32>
    %79 = vector.shape_cast %78 : vector<8xf32> to vector<8x1xf32>
    %cst_34 = arith.constant 3.125000e-02 : f32
    %80 = vector.broadcast %cst_34 : f32 to vector<8x1xf32>
    %81 = arith.mulf %79, %80 : vector<8x1xf32>
    %82 = arith.mulf %75, %75 : vector<8x128xf32>
    %cst_35 = arith.constant dense<0.000000e+00> : vector<8xf32>
    %83 = vector.multi_reduction <add>, %82, %cst_35 [1] : vector<8x128xf32> to vector<8xf32>
    %84 = vector.shape_cast %83 : vector<8xf32> to vector<8x1xf32>
    %cst_36 = arith.constant 3.125000e-02 : f32
    %85 = vector.broadcast %cst_36 : f32 to vector<8x1xf32>
    %86 = arith.mulf %84, %85 : vector<8x1xf32>
    %87 = arith.mulf %81, %81 : vector<8x1xf32>
    %88 = arith.subf %86, %87 : vector<8x1xf32>
    %89 = vector.broadcast %81 : vector<8x1xf32> to vector<8x128xf32>
    %90 = arith.subf %75, %89 : vector<8x128xf32>
    %cst_37 = arith.constant 9.99999974E-6 : f32
    %91 = vector.broadcast %cst_37 : f32 to vector<8x1xf32>
    %92 = arith.addf %88, %91 : vector<8x1xf32>
    %93 = math.rsqrt %92 : vector<8x1xf32>
    %94 = vector.broadcast %93 : vector<8x1xf32> to vector<8x128xf32>
    %95 = arith.mulf %90, %94 : vector<8x128xf32>
    %96 = vector.broadcast %76 : vector<1x128xf32> to vector<8x128xf32>
    %97 = arith.mulf %95, %96 : vector<8x128xf32>
    %98 = vector.broadcast %77 : vector<1x128xf32> to vector<8x128xf32>
    %99 = arith.addf %97, %98 : vector<8x128xf32>
    %100 = arith.truncf %99 : vector<8x128xf32> to vector<8x128xbf16>
    %c0_38 = arith.constant 0 : index
    %c0_39 = arith.constant 0 : index
    %101 = vector.load %arg7[%c0_38, %c0_39] : memref<128x128xbf16, #tpu.memory_space<vmem>>, vector<128x128xbf16>
    %cst_40 = arith.constant dense<0.000000e+00> : vector<8x128xf32>
    %102 = tpu.matmul %100, %101, %cst_40 {dimension_numbers = #tpu.dot_dimension_numbers<[1], [0], [0], [1], [0, 0, 1, 1], [], []>} : vector<8x128xbf16>, vector<128x128xbf16>, vector<8x128xf32> -> vector<8x128xf32>
    %c10 = arith.constant 10 : index
    %c0_41 = arith.constant 0 : index
    %103 = vector.load %arg9[%c10, %c0_41] : memref<16x128xf32, #tpu.memory_space<vmem>>, vector<1x128xf32>
    %104 = vector.broadcast %103 : vector<1x128xf32> to vector<8x128xf32>
    %105 = arith.addf %102, %104 : vector<8x128xf32>
    %cst_42 = arith.constant 0.000000e+00 : f32
    %106 = vector.broadcast %cst_42 : f32 to vector<8x128xf32>
    %107 = arith.maximumf %105, %106 : vector<8x128xf32>
    %108 = arith.truncf %107 : vector<8x128xf32> to vector<8x128xbf16>
    %c0_43 = arith.constant 0 : index
    %c0_44 = arith.constant 0 : index
    %109 = vector.load %arg8[%c0_43, %c0_44] : memref<128x128xbf16, #tpu.memory_space<vmem>>, vector<128x128xbf16>
    %cst_45 = arith.constant dense<0.000000e+00> : vector<8x128xf32>
    %110 = tpu.matmul %108, %109, %cst_45 {dimension_numbers = #tpu.dot_dimension_numbers<[1], [0], [0], [1], [0, 0, 1, 1], [], []>} : vector<8x128xbf16>, vector<128x128xbf16>, vector<8x128xf32> -> vector<8x128xf32>
    %c11 = arith.constant 11 : index
    %c0_46 = arith.constant 0 : index
    %111 = vector.load %arg9[%c11, %c0_46] : memref<16x128xf32, #tpu.memory_space<vmem>>, vector<1x128xf32>
    %112 = vector.broadcast %111 : vector<1x128xf32> to vector<8x128xf32>
    %113 = arith.addf %110, %112 : vector<8x128xf32>
    %c0_47 = arith.constant 0 : index
    %c0_48 = arith.constant 0 : index
    %114 = vector.load %arg10[%c0_47, %c0_48] : memref<8x128xf32, #tpu.memory_space<vmem>>, vector<8x128xf32>
    tpu.vector_store %arg10[%c0_47, %c0_48], %113 {strides = array<i32>} : memref<8x128xf32, #tpu.memory_space<vmem>>, vector<8x128xf32>,
    %c0_49 = arith.constant 0 : index
    %c0_50 = arith.constant 0 : index
    %115 = vector.load %arg11[%c0_49, %c0_50] : memref<8x128xf32, #tpu.memory_space<vmem>>, vector<8x128xf32>
    tpu.vector_store %arg11[%c0_49, %c0_50], %36 {strides = array<i32>} : memref<8x128xf32, #tpu.memory_space<vmem>>, vector<8x128xf32>,
    %c0_51 = arith.constant 0 : index
    %c0_52 = arith.constant 0 : index
    %116 = vector.load %arg12[%c0_51, %c0_52] : memref<8x128xf32, #tpu.memory_space<vmem>>, vector<8x128xf32>
    tpu.vector_store %arg12[%c0_51, %c0_52], %75 {strides = array<i32>} : memref<8x128xf32, #tpu.memory_space<vmem>>, vector<8x128xf32>,
    return
  }
  func.func @transform_0(%arg0: i32) -> (i32, i32) {
    %c0_i32 = arith.constant 0 : i32
    %c0_i32_0 = arith.constant 0 : i32
    return %arg0, %c0_i32 : i32, i32
  }
  func.func @transform_1(%arg0: i32) -> (i32, i32) {
    %c0_i32 = arith.constant 0 : i32
    %c0_i32_0 = arith.constant 0 : i32
    return %arg0, %c0_i32 : i32, i32
  }
  func.func @transform_2(%arg0: i32) -> (i32, i32) {
    %c0_i32 = arith.constant 0 : i32
    %c0_i32_0 = arith.constant 0 : i32
    return %arg0, %c0_i32 : i32, i32
  }
  func.func @transform_3(%arg0: i32) -> (i32, i32) {
    %c0_i32 = arith.constant 0 : i32
    %c0_i32_0 = arith.constant 0 : i32
    return %arg0, %c0_i32 : i32, i32
  }
  func.func @transform_4(%arg0: i32) -> (i32, i32) {
    %c0_i32 = arith.constant 0 : i32
    %c0_i32_0 = arith.constant 0 : i32
    %c0_i32_1 = arith.constant 0 : i32
    return %c0_i32, %c0_i32_0 : i32, i32
  }
  func.func @transform_5(%arg0: i32) -> (i32, i32) {
    %c0_i32 = arith.constant 0 : i32
    %c0_i32_0 = arith.constant 0 : i32
    %c0_i32_1 = arith.constant 0 : i32
    return %c0_i32, %c0_i32_0 : i32, i32
  }
  func.func @transform_6(%arg0: i32) -> (i32, i32) {
    %c0_i32 = arith.constant 0 : i32
    %c0_i32_0 = arith.constant 0 : i32
    %c0_i32_1 = arith.constant 0 : i32
    return %c0_i32, %c0_i32_0 : i32, i32
  }
  func.func @transform_7(%arg0: i32) -> (i32, i32) {
    %c0_i32 = arith.constant 0 : i32
    %c0_i32_0 = arith.constant 0 : i32
    %c0_i32_1 = arith.constant 0 : i32
    return %c0_i32, %c0_i32_0 : i32, i32
  }
  func.func @transform_8(%arg0: i32) -> (i32, i32) {
    %c0_i32 = arith.constant 0 : i32
    %c0_i32_0 = arith.constant 0 : i32
    %c0_i32_1 = arith.constant 0 : i32
    return %c0_i32, %c0_i32_0 : i32, i32
  }
  func.func @transform_9(%arg0: i32) -> (i32, i32) {
    %c0_i32 = arith.constant 0 : i32
    %c0_i32_0 = arith.constant 0 : i32
    return %arg0, %c0_i32 : i32, i32
  }
  func.func @transform_10(%arg0: i32) -> (i32, i32) {
    %c0_i32 = arith.constant 0 : i32
    %c0_i32_0 = arith.constant 0 : i32
    return %arg0, %c0_i32 : i32, i32
  }
  func.func @transform_11(%arg0: i32) -> (i32, i32) {
    %c0_i32 = arith.constant 0 : i32
    %c0_i32_0 = arith.constant 0 : i32
    return %arg0, %c0_i32 : i32, i32
  }
}

</mosaic_0001>

<bundles_post_ra>
// kernel: forward.1
= control target key start
LH: loop header
LB: loop body
LE: loop exit
PB: predicated region body
PF: predicated region fallthrough
CT: control target
= control target key end

     0   :  { %17 = vsyncpa [#allocation3], 0  ;;  %s1134_s0 = inlined_call_operand.vmem [shape: bf16[8,128], index: 0, kind: input, shape index: {}]   ;;  %s1135_s1 = inlined_call_operand.vmem [shape: f32[8,128], index: 1, kind: input, shape index: {}, may-alias: {1,10}]   ;;  %s1136_s2 = inlined_call_operand.vmem [shape: f32[8,128], index: 2, kind: input, shape index: {}, may-alias: {2,11}]   ;;  %s1137_s3 = inlined_call_operand.vmem [shape: bf16[8,128], index: 3, kind: input, shape index: {}]   ;;  %s1138_s4 = inlined_call_operand.hbm [shape: bf16[128,128], index: 4, kind: input, shape index: {}]   ;;  %s1139_s5 = inlined_call_operand.hbm [shape: bf16[128,128], index: 5, kind: input, shape index: {}]   ;;  %s1140_s6 = inlined_call_operand.vmem [shape: bf16[128,128], index: 6, kind: input, shape index: {}]   ;;  %s1141_s7 = inlined_call_operand.vmem [shape: bf16[128,128], index: 7, kind: input, shape index: {}]   ;;  %s1142_s8 = inlined_call_operand.hbm [shape: f32[16,128], index: 8, kind: input, shape index: {}]   ;;  %s1143_s9 = inlined_call_operand.vmem [shape: f32[8,128], index: 9, kind: output, shape index: {0}]   ;;  %s1144_s10 = inlined_call_operand.vmem [shape: f32[8,128], index: 10, kind: output, shape index: {1}, may-alias: {1,10}]   ;;  %s1145_s11 = inlined_call_operand.vmem [shape: f32[8,128], index: 11, kind: output, shape index: {2}, may-alias: {2,11}]  }
   0x1   :  { %18 = vsyncpa [#allocation5], 0  ;;  %s913_s17 = smov [#allocation4]   ;;  %s914_s19 = smov [#allocation2]  }
   0x2   :  { %s44_s18 = sshll.u32 %s913_s17, 4  ;;  %s32_s20 = sshll.u32 %s914_s19, 4  ;;  %s45_s18 = int_to_ptr.vmem [resolvable:$true] %s44_s18  ;;  %s982_s20 = int_to_ptr.vmem [resolvable:$true] %s32_s20 }
   0x3   :  { %s843_s23 = scalar_lea.hbm %s1139_s5, 1024 }
   0x4   :  { %p844_p0 = scmp.ne.s32.totalorder %s1139_s5, %s843_s23  ;;  %p847_p1 = scmp.lt.u32.totalorder %s843_s23, %s1139_s5 }
   0x6   :  { %p849_p2 = pnand %p847_p1, %p844_p0 }
   0x8   :  { %852 = shalt.err (!%p849_p2)
}
   0x9   :  { %s853_s28 = scalar_lea.vmem %s45_s18, 1024  ;;  %p858_p4 = scmp.lt.s32.totalorder %s45_s18, %s45_s18 }
   0xa   :  { %p854_p3 = scmp.ne.s32.totalorder %s45_s18, %s853_s28  ;;  %p859_p5 = scmp.lt.s32.totalorder %s853_s28, %s853_s28 }
   0xc   :  { %p860_p6 = por %p859_p5, %p858_p4 }
   0xe   :  { %p861_p7 = pnand %p860_p6, %p854_p3 }
  0x10   :  { %864 = shalt.err (!%p861_p7)
}
  0x11   :  { %s915_s29 = smov 64   ;;  %s916_s30 = smov 4  }
  0x12   :  { %50 = dma.hbm_to_vmem [thread:$0]  %s1139_s5, 1024, %s45_s18, [#allocation5], %s915_s29, %s915_s29, %s916_s30  }
  0x13   :  { %s865_s16 = scalar_lea.hbm %s1138_s4, 1024 }
  0x14   :  { %p866_p8 = scmp.ne.s32.totalorder %s1138_s4, %s865_s16  ;;  %p869_p9 = scmp.lt.u32.totalorder %s865_s16, %s1138_s4 }
  0x16   :  { %p871_p10 = pnand %p869_p9, %p866_p8 }
  0x18   :  { %874 = shalt.err (!%p871_p10)
}
  0x19   :  { %s875_s23 = scalar_lea.vmem %s982_s20, 1024  ;;  %p880_p12 = scmp.lt.s32.totalorder %s982_s20, %s982_s20 }
  0x1a   :  { %p876_p11 = scmp.ne.s32.totalorder %s982_s20, %s875_s23  ;;  %p881_p13 = scmp.lt.s32.totalorder %s875_s23, %s875_s23 }
  0x1c   :  { %p882_p0 = por %p881_p13, %p880_p12 }
  0x1e   :  { %p883_p1 = pnand %p882_p0, %p876_p11 }
  0x20   :  { %886 = shalt.err (!%p883_p1)
}
  0x21   :  { %38 = dma.hbm_to_vmem [thread:$0]  %s1138_s4, 1024, %s982_s20, [#allocation3], %s915_s29, %s915_s29, %s916_s30  }
  0x22   :  { %s917_s24 = smov [#allocation6]   ;;  %s887_s28 = scalar_lea.hbm %s1142_s8, 256 }
  0x23   :  { %s60_s25 = sshll.u32 %s917_s24, 4  ;;  %p888_p2 = scmp.ne.s32.totalorder %s1142_s8, %s887_s28  ;;  %s61_s25 = int_to_ptr.vmem [resolvable:$true] %s60_s25 }
  0x24   :  { %p891_p3 = scmp.lt.u32.totalorder %s887_s28, %s1142_s8 }
  0x26   :  { %p893_p4 = pnand %p891_p3, %p888_p2 }
  0x28   :  { %896 = shalt.err (!%p893_p4)
}
  0x29   :  { %s897_s16 = scalar_lea.vmem %s61_s25, 256  ;;  %p902_p6 = scmp.lt.s32.totalorder %s61_s25, %s61_s25 }
  0x2a   :  { %p898_p5 = scmp.ne.s32.totalorder %s61_s25, %s897_s16  ;;  %p903_p7 = scmp.lt.s32.totalorder %s897_s16, %s897_s16 }
  0x2c   :  { %p904_p8 = por %p903_p7, %p902_p6 }
  0x2e   :  { %p905_p9 = pnand %p904_p8, %p898_p5 }
  0x30   :  { %908 = shalt.err (!%p905_p9)
}
  0x31   :  { %s918_s4 = smov 128   ;;  %s919_s20 = smov 8  }
  0x32   :  { %66 = dma.hbm_to_vmem [thread:$0]  %s1142_s8, 256, %s61_s25, [#allocation5], %s918_s4, %s918_s4, %s919_s20  }
  0x33   :  { %909 = dma.done.wait [#allocation3], 1024  }
  0x34   :  { %910 = vsyncadd [#allocation3], 4294966272 }
  0x35   :  { %911 = dma.done.wait [#allocation5], 1280  }
  0x36   :  { %912 = vsyncadd [#allocation5], 4294966016  ;;  %v920_v0 = vmov 0.0   ;;  %vm921_vm0 = vmmov 0   ;;  %v801_v1 = vld [vmem:[#allocation2] sm:$0xff]   ;;  %v802_v2 = vld [vmem:[#allocation2 + $0x8] sm:$0xff]  }
  0x37   :  { %712 = vmatprep.subr.bf16.mxu0 %v920_v0  ;;  %728 = vmatprep.mubr.msk.bf16.mxu0 %vm921_vm0, %v920_v0  ;;  %v803_v3 = vld [vmem:[#allocation2 + $0x10] sm:$0xff]   ;;  %v804_v4 = vld [vmem:[#allocation2 + $0x18] sm:$0xff]   ;;  %v805_v5 = vld [vmem:[#allocation2 + $0x20] sm:$0xff]  }
  0x38   :  { %732 = vmatprep.subr.bf16.mxu1 %v920_v0  ;;  %748 = vmatprep.mubr.msk.bf16.mxu1 %vm921_vm0, %v920_v0  ;;  %v806_v6 = vld [vmem:[#allocation2 + $0x28] sm:$0xff]   ;;  %v807_v7 = vld [vmem:[#allocation2 + $0x30] sm:$0xff]   ;;  %v808_v8 = vld [vmem:[#allocation2 + $0x38] sm:$0xff]  }
  0x39   :  { %713 = vmatpush3.bf16.msra.mxu0 %v801_v1  ;;  %v77_v9 = vld [vmem:[%s1134_s0] sm:$0xf]  ;;  %v810_v18 = vld [vmem:[#allocation4 + $0x8] sm:$0xff]   ;;  %v811_v19 = vld [vmem:[#allocation4 + $0x10] sm:$0xff]  }
  0x3a   :  { %714 = vmatprep.subr.bf16.mxu0 %v920_v0  ;;  %v632_v10 = vld [vmem:[#allocation6] ss:$0 sm:$0xff]  ;;  %v812_v20 = vld [vmem:[#allocation4 + $0x18] sm:$0xff]   ;;  %v814_v22 = vld [vmem:[#allocation4 + $0x28] sm:$0xff]  }
  0x3b   :  { %v809_v17 = vld [vmem:[#allocation4] sm:$0xff]   ;;  %v815_v23 = vld [vmem:[#allocation4 + $0x30] sm:$0xff]   ;;  %v816_v24 = vld [vmem:[#allocation4 + $0x38] sm:$0xff]  }
  0x3c   :  { %733 = vmatpush3.bf16.msra.mxu1 %v809_v17  ;;  %v813_v21 = vld [vmem:[#allocation4 + $0x20] sm:$0xff]  }
  0x3d   :  { %715 = vmatpush3.bf16.msra.mxu0 %v802_v2  ;;  %734 = vmatprep.subr.bf16.mxu1 %v920_v0  ;;  %v641_v34 = vld [vmem:[#allocation6 + $0x1] ss:$0 sm:$0xff]  ;;  %v642_v36 = vld [vmem:[#allocation6 + $0x2] ss:$0 sm:$0xff]  ;;  %v643_v41 = vld [vmem:[#allocation6 + $0x3] ss:$0 sm:$0xff] }
  0x3e   :  { %716 = vmatprep.subr.bf16.mxu0 %v920_v0  ;;  %v212_v39 = vld [vmem:[%s1135_s1] sm:$0xff] }
  0x3f   :  { %v223_v45 = vld [vmem:[%s1137_s3] sm:$0xf]  ;;  %v644_v48 = vld [vmem:[#allocation6 + $0x4] ss:$0 sm:$0xff]  ;;  %v653_v2 = vld [vmem:[#allocation6 + $0x5] ss:$0 sm:$0xff] }
  0x40   :  { %735 = vmatpush3.bf16.msra.mxu1 %v810_v18  ;;  %v817_v55 = vld [vmem:[%s1140_s6] sm:$0xff]   ;;  %v822_v18 = vld [vmem:[%s1140_s6 + $0x28] sm:$0xff]  }
  0x41   :  { %717 = vmatpush3.bf16.msra.mxu0 %v803_v3  ;;  %736 = vmatprep.subr.bf16.mxu1 %v920_v0  ;;  %v821_v17 = vld [vmem:[%s1140_s6 + $0x20] sm:$0xff]  }
  0x42   :  { %718 = vmatprep.subr.bf16.mxu0 %v920_v0 }
  0x44   :  { %737 = vmatpush3.bf16.msra.mxu1 %v811_v19  ;;  %v823_v19 = vld [vmem:[%s1140_s6 + $0x30] sm:$0xff]  }
  0x45   :  { %719 = vmatpush3.bf16.msra.mxu0 %v804_v4  ;;  %738 = vmatprep.subr.bf16.mxu1 %v920_v0  ;;  %v654_v4 = vld [vmem:[#allocation6 + $0x6] ss:$0 sm:$0xff] }
  0x46   :  { %720 = vmatprep.subr.bf16.mxu0 %v920_v0 }
  0x48   :  { %739 = vmatpush3.bf16.msra.mxu1 %v812_v20  ;;  %v824_v20 = vld [vmem:[%s1140_s6 + $0x38] sm:$0xff]  }
  0x49   :  { %721 = vmatpush3.bf16.msra.mxu0 %v805_v5  ;;  %740 = vmatprep.subr.bf16.mxu1 %v920_v0 }
  0x4a   :  { %722 = vmatprep.subr.bf16.mxu0 %v920_v0 }
  0x4c   :  { %741 = vmatpush3.bf16.msra.mxu1 %v813_v21  ;;  %v825_v21 = vld [vmem:[%s1141_s7] sm:$0xff]  }
  0x4d   :  { %723 = vmatpush3.bf16.msra.mxu0 %v806_v6  ;;  %742 = vmatprep.subr.bf16.mxu1 %v920_v0 }
  0x4e   :  { %724 = vmatprep.subr.bf16.mxu0 %v920_v0 }
  0x50   :  { %743 = vmatpush3.bf16.msra.mxu1 %v814_v22  ;;  %v826_v22 = vld [vmem:[%s1141_s7 + $0x8] sm:$0xff]  }
  0x51   :  { %725 = vmatpush3.bf16.msra.mxu0 %v807_v7  ;;  %744 = vmatprep.subr.bf16.mxu1 %v920_v0  ;;  %v359_v7 = vld [vmem:[%s1136_s2] sm:$0xff] }
  0x52   :  { %726 = vmatprep.subr.bf16.mxu0 %v920_v0 }
  0x54   :  { %745 = vmatpush3.bf16.msra.mxu1 %v815_v23  ;;  %v827_v23 = vld [vmem:[%s1141_s7 + $0x10] sm:$0xff]  }
  0x55   :  { %727 = vmatpush3.bf16.msra.mxu0 %v808_v8  ;;  %746 = vmatprep.subr.bf16.mxu1 %v920_v0 }
  0x56   :  { %752 = vmatprep.subr.bf16.mxu0 %v920_v0 }
  0x58   :  { %729 = vmatmul.mubr.bf16.vlgmr.msra.gmra.mrb[0].mxu0 %v77_v9  ;;  %747 = vmatpush3.bf16.msra.mxu1 %v816_v24  ;;  %v655_v9 = vld [vmem:[#allocation6 + $0x7] ss:$0 sm:$0xff]  ;;  %v828_v24 = vld [vmem:[%s1141_s7 + $0x18] sm:$0xff]  }
  0x59   :  { %768 = vmatprep.mubr.msk.bf16.mxu0 %vm921_vm0, %v920_v0  ;;  %772 = vmatprep.subr.bf16.mxu1 %v920_v0 }
  0x5a   :  { %753 = vmatpush3.bf16.msra.mxu0 %v817_v55 }
  0x5b   :  { %754 = vmatprep.subr.bf16.mxu0 %v920_v0 }
 0x12b   :  { %v181_v11 = vpop.f32.mrb[0].mxu0 }
 0x12c   :  { %v182_v12 = vadd.f32 %v632_v10, %v181_v11  ;;  %v730_v13 = vpop.f32.mrb[1].mxu0 }
 0x12d   :  { %v184_v14 = vpop.f32.mrb[2].mxu0 }
 0x12e   :  { %189 = vadd.xlane.f32.xlu0 %v182_v12  ;;  %v731_v15 = vpop.f32.mrb[3].mxu0  ;;  %v192_v16 = vmul.f32 %v182_v12, %v182_v12  ;;  %v818_v14 = vld [vmem:[%s1140_s6 + $0x8] sm:$0xff]  }
 0x12f   :  { %755 = vmatpush3.bf16.msra.mxu0 %v818_v14  ;;  %v819_v15 = vld [vmem:[%s1140_s6 + $0x10] sm:$0xff]  }
 0x130   :  { %756 = vmatprep.subr.bf16.mxu0 %v920_v0 }
 0x132   :  { %193 = vadd.xlane.f32.xlu0 %v192_v16  ;;  %v820_v16 = vld [vmem:[%s1140_s6 + $0x18] sm:$0xff]  }
 0x133   :  { %757 = vmatpush3.bf16.msra.mxu0 %v819_v15 }
 0x134   :  { %758 = vmatprep.subr.bf16.mxu0 %v920_v0 }
 0x137   :  { %759 = vmatpush3.bf16.msra.mxu0 %v820_v16 }
 0x138   :  { %760 = vmatprep.subr.bf16.mxu0 %v920_v0 }
 0x13b   :  { %761 = vmatpush3.bf16.msra.mxu0 %v821_v17 }
 0x13c   :  { %762 = vmatprep.subr.bf16.mxu0 %v920_v0 }
 0x13f   :  { %763 = vmatpush3.bf16.msra.mxu0 %v822_v18 }
 0x140   :  { %764 = vmatprep.subr.bf16.mxu0 %v920_v0 }
 0x143   :  { %765 = vmatpush3.bf16.msra.mxu0 %v823_v19 }
 0x144   :  { %766 = vmatprep.subr.bf16.mxu0 %v920_v0 }
 0x147   :  { %767 = vmatpush3.bf16.msra.mxu0 %v824_v20 }
 0x1bb   :  { %v190_v25 = vpop.xlane.xlu0 %189 }
 0x1bc   :  { %v191_v26 = vmul.f32 0.03125, %v190_v25  ;;  %v829_v25 = vld [vmem:[%s1141_s7 + $0x20] sm:$0xff]  }
 0x1be   :  { %v196_v28 = vmul.f32 %v191_v26, %v191_v26  ;;  %v198_v32 = vsub.f32 %v182_v12, %v191_v26  ;;  %v830_v26 = vld [vmem:[%s1141_s7 + $0x28] sm:$0xff]  }
 0x1bf   :  { %v194_v27 = vpop.xlane.xlu0 %193 }
 0x1c0   :  { %v195_v29 = vmul.f32 0.03125, %v194_v27 }
 0x1c2   :  { %v197_v30 = vsub.f32 %v195_v29, %v196_v28 }
 0x1c4   :  { %v199_v31 = vadd.f32 1e-05, %v197_v30 }
 0x1c6   :  { %833 = vrsqrt.f32 %v199_v31 }
 0x1d0   :  { %v834_v33 = vpop.eup %833 }
 0x1d1   :  { %v201_v35 = vmul.f32 %v834_v33, %v198_v32 }
 0x1d3   :  { %v206_v37 = vmul.f32 %v641_v34, %v201_v35 }
 0x1d5   :  { %v211_v38 = vadd.f32 %v642_v36, %v206_v37  ;;  %v656_v36 = vld [vmem:[#allocation6 + $0x8] ss:$0 sm:$0xff] }
 0x1d7   :  { %835 = vtanh.f32 %v211_v38  ;;  %v657_v38 = vld [vmem:[#allocation6 + $0x9] ss:$0 sm:$0xff] }
 0x1e1   :  { %v836_v40 = vpop.eup %835 }
 0x1e2   :  { %v214_v42 = vsub.f32 %v836_v40, %v212_v39 }
 0x1e4   :  { %v220_v43 = vmul.f32 %v643_v41, %v214_v42  ;;  %v831_v42 = vld [vmem:[%s1141_s7 + $0x30] sm:$0xff]  }
 0x1e6   :  { %v221_v44 = vadd.f32 %v220_v43, %v212_v39  ;;  %v832_v43 = vld [vmem:[%s1141_s7 + $0x38] sm:$0xff]  }
 0x1e8   :  { %v222_v46 = vpack.c.bf16 %v221_v44, %v221_v44  ;;  %616 = vst [vmem:[%s1144_s10] sm:$0xff] %v221_v44  ;;  %v658_v44 = vld [vmem:[#allocation6 + $0xa] ss:$0 sm:$0xff] }
 0x1ea   :  { %v224_v47 = vadd.bf16 %v223_v45, %v222_v46 }
 0x1ec   :  { %749 = vmatmul.mubr.bf16.vlgmr.msra.gmra.mrb[0].mxu1 %v224_v47 }
 0x1ed   :  { %788 = vmatprep.mubr.msk.bf16.mxu1 %vm921_vm0, %v920_v0  ;;  %773 = vmatpush3.bf16.msra.mxu1 %v825_v21 }
 0x1ee   :  { %774 = vmatprep.subr.bf16.mxu1 %v920_v0 }
 0x1f1   :  { %775 = vmatpush3.bf16.msra.mxu1 %v826_v22 }
 0x1f2   :  { %776 = vmatprep.subr.bf16.mxu1 %v920_v0 }
 0x1f5   :  { %777 = vmatpush3.bf16.msra.mxu1 %v827_v23 }
 0x1f6   :  { %778 = vmatprep.subr.bf16.mxu1 %v920_v0 }
 0x1f9   :  { %779 = vmatpush3.bf16.msra.mxu1 %v828_v24 }
 0x1fa   :  { %780 = vmatprep.subr.bf16.mxu1 %v920_v0 }
 0x1fd   :  { %781 = vmatpush3.bf16.msra.mxu1 %v829_v25 }
 0x1fe   :  { %782 = vmatprep.subr.bf16.mxu1 %v920_v0 }
 0x201   :  { %783 = vmatpush3.bf16.msra.mxu1 %v830_v26 }
 0x202   :  { %784 = vmatprep.subr.bf16.mxu1 %v920_v0 }
 0x205   :  { %785 = vmatpush3.bf16.msra.mxu1 %v831_v42 }
 0x206   :  { %786 = vmatprep.subr.bf16.mxu1 %v920_v0 }
 0x209   :  { %787 = vmatpush3.bf16.msra.mxu1 %v832_v43 }
 0x2bf   :  { %v328_v49 = vpop.f32.mrb[0].mxu1 }
 0x2c0   :  { %v329_v50 = vadd.f32 %v644_v48, %v328_v49  ;;  %v750_v51 = vpop.f32.mrb[1].mxu1 }
 0x2c1   :  { %v331_v52 = vpop.f32.mrb[2].mxu1 }
 0x2c2   :  { %336 = vadd.xlane.f32.xlu1 %v329_v50  ;;  %v751_v53 = vpop.f32.mrb[3].mxu1  ;;  %v339_v54 = vmul.f32 %v329_v50, %v329_v50  ;;  %v667_v52 = vld [vmem:[#allocation6 + $0xb] ss:$0 sm:$0xff] }
 0x2c6   :  { %340 = vadd.xlane.f32.xlu1 %v339_v54 }
 0x34f   :  { %v337_v56 = vpop.xlane.xlu1 %336 }
 0x350   :  { %v338_v57 = vmul.f32 0.03125, %v337_v56 }
 0x352   :  { %v343_v59 = vmul.f32 %v338_v57, %v338_v57  ;;  %v345_v63 = vsub.f32 %v329_v50, %v338_v57 }
 0x353   :  { %v341_v58 = vpop.xlane.xlu1 %340 }
 0x354   :  { %v342_v60 = vmul.f32 0.03125, %v341_v58 }
 0x356   :  { %v344_v61 = vsub.f32 %v342_v60, %v343_v59 }
 0x358   :  { %v346_v62 = vadd.f32 1e-05, %v344_v61 }
 0x35a   :  { %837 = vrsqrt.f32 %v346_v62 }
 0x364   :  { %v838_v1 = vpop.eup %837 }
 0x365   :  { %v348_v3 = vmul.f32 %v838_v1, %v345_v63 }
 0x367   :  { %v353_v5 = vmul.f32 %v653_v2, %v348_v3 }
 0x369   :  { %v358_v6 = vadd.f32 %v654_v4, %v353_v5 }
 0x36b   :  { %839 = vtanh.f32 %v358_v6 }
 0x375   :  { %v840_v8 = vpop.eup %839 }
 0x376   :  { %v361_v10 = vsub.f32 %v840_v8, %v359_v7 }
 0x378   :  { %v367_v11 = vmul.f32 %v655_v9, %v361_v10 }
 0x37a   :  { %v368_v12 = vadd.f32 %v367_v11, %v359_v7 }
 0x37c   :  { %371 = vadd.xlane.f32.xlu0 %v368_v12  ;;  %617 = vst [vmem:[%s1145_s11] sm:$0xff] %v368_v12  ;;  %v374_v13 = vmul.f32 %v368_v12, %v368_v12 }
 0x37e   :  { %375 = vadd.xlane.f32.xlu1 %v374_v13 }
 0x409   :  { %v372_v27 = vpop.xlane.xlu0 %371 }
 0x40a   :  { %v373_v28 = vmul.f32 0.03125, %v372_v27 }
 0x40b   :  { %v376_v29 = vpop.xlane.xlu1 %375 }
 0x40c   :  { %v378_v30 = vmul.f32 %v373_v28, %v373_v28  ;;  %v377_v31 = vmul.f32 0.03125, %v376_v29  ;;  %v380_v34 = vsub.f32 %v368_v12, %v373_v28 }
 0x40e   :  { %v379_v32 = vsub.f32 %v377_v31, %v378_v30 }
 0x410   :  { %v381_v33 = vadd.f32 1e-05, %v379_v32 }
 0x412   :  { %841 = vrsqrt.f32 %v381_v33 }
 0x41c   :  { %v842_v35 = vpop.eup %841 }
 0x41d   :  { %v383_v37 = vmul.f32 %v842_v35, %v380_v34 }
 0x41f   :  { %v388_v39 = vmul.f32 %v656_v36, %v383_v37 }
 0x421   :  { %v393_v40 = vadd.f32 %v657_v38, %v388_v39 }
 0x423   :  { %v394_v41 = vpack.c.bf16 %v393_v40, %v393_v40 }
 0x425   :  { %769 = vmatmul.mubr.bf16.vlgmr.msra.gmra.mrb[4].mxu0 %v394_v41 }
 0x4f8   :  { %v498_v45 = vpop.f32.mrb[4].mxu0 }
 0x4f9   :  { %v499_v46 = vadd.f32 %v658_v44, %v498_v45  ;;  %v770_v47 = vpop.f32.mrb[5].mxu0 }
 0x4fa   :  { %v501_v48 = vpop.f32.mrb[6].mxu0 }
 0x4fb   :  { %v504_v49 = vmax.f32 %v499_v46, 0.0  ;;  %v771_v50 = vpop.f32.mrb[7].mxu0 }
 0x4fd   :  { %v505_v51 = vpack.c.bf16 %v504_v49, %v504_v49 }
 0x4ff   :  { %789 = vmatmul.mubr.bf16.vlgmr.msra.gmra.mrb[4].mxu1 %v505_v51 }
 0x5d2   :  { %v609_v53 = vpop.f32.mrb[4].mxu1 }
 0x5d3   :  { %v610_v54 = vadd.f32 %v667_v52, %v609_v53  ;;  %v790_v55 = vpop.f32.mrb[5].mxu1 }
 0x5d4   :  { %v612_v56 = vpop.f32.mrb[6].mxu1 }
 0x5d5   :  { %615 = vst [vmem:[%s1143_s9] sm:$0xff] %v610_v54  ;;  %v791_v0 = vpop.f32.mrb[7].mxu1 }
 0x5d6   :  { %630 = vsyncpa [#allocation3], 1 }
 0x5d7   :  { %631 = vsyncpa [#allocation5], 1 }

</bundles_post_ra>
